<compile_context>
chip_gen: v7x
topology: tpu7x:2x2x1
jax: 0.10.0
libtpu: 0.0.40
codegen_flags: <defaults>
</compile_context>

<pallas_src>
import numpy as np
import jax
import jax.numpy as jnp
from jax.experimental import pallas as pl
from jax.experimental.pallas import tpu as pltpu


def _make_mlp_kernel(num_layers, skip_layers):
    skip_layers = frozenset(skip_layers)

    def kernel(x_ref, *refs):
        out_ref = refs[-1]
        params = refs[:-1]
        x_t = x_ref[...]                         # (d_in, TN), lane-dense, compute dtype
        h = x_t
        idx = 0
        for layer in range(num_layers - 1):
            if layer in skip_layers:
                # torch: y = (cat([h, x_init], -1) / sqrt(2)) @ W.T + b
                # Split matmul avoids a lane-dim concat; the 1/sqrt(2) scale
                # is already folded into w_h / w_x at init.
                w_h = params[idx][...]           # (out_dim, k)
                w_x = params[idx + 1][...]       # (out_dim, d_in)
                b = params[idx + 2][...]         # (out_dim, 1), f32
                idx += 3
                y = (jnp.dot(w_h, h, preferred_element_type=jnp.float32)
                     + jnp.dot(w_x, x_t, preferred_element_type=jnp.float32))
            else:
                w = params[idx][...]             # (out_dim, in_dim)
                b = params[idx + 1][...]         # (out_dim, 1), f32
                idx += 2
                y = jnp.dot(w, h, preferred_element_type=jnp.float32)
            y = y + b                            # bias add in f32
            if layer < num_layers - 2:
                y = jnp.maximum(y, 0.0)          # ReLU in f32
                h = y.astype(x_t.dtype)          # next dot operand in compute dtype
            else:
                h = y
        out_ref[...] = h.astype(out_ref.dtype)   # (d_out, TN) lane-dense store

    return kernel


class ImplicitNetPallas:
    def __init__(self, d_in, dims, skip_in=(), d_out=4, dim_excludes_skip=False,
                 combine_layer=1000, combine_type='average', key=None,
                 compute_dtype=jnp.float32):
        dims = [d_in] + list(dims) + [d_out]
        if dim_excludes_skip:
            for i in range(1, len(dims) - 1):
                if i in skip_in:
                    dims[i] += d_in
        self.num_layers = len(dims)
        self.skip_in = tuple(skip_in)
        self.dims = dims
        self.d_in = d_in
        self.d_out = d_out
        self.combine_layer = combine_layer
        # TODO(synk): combine_type ('average') is never exercised by this
        # module's forward pass (combine_layer defaults past all layers), so it
        # is intentionally left unimplemented.
        self.combine_type = combine_type
        self.compute_dtype = compute_dtype

        # Layers whose input gets the [h, x_init]/sqrt(2) concat in forward.
        self._skip_layers = tuple(
            l for l in range(self.num_layers - 1)
            if l < combine_layer and l in self.skip_in)

        if key is None:
            key = jax.random.PRNGKey(0)

        # Reference (PyTorch-layout) parameters, f32, unscaled.
        self.weights = []   # (out_dim, in_dim)  == nn.Linear.weight
        self.biases = []    # (out_dim,)         == nn.Linear.bias
        for layer in range(self.num_layers - 1):
            if layer + 1 in self.skip_in:
                out_dim = dims[layer + 1] - d_in
            else:
                out_dim = dims[layer + 1]
            in_dim = dims[layer]
            key, sub = jax.random.split(key)
            # kaiming_normal_(a=0, mode='fan_in') -> std = sqrt(2 / fan_in); bias = 0
            std = np.sqrt(2.0 / in_dim)
            w = jax.random.normal(sub, (out_dim, in_dim), jnp.float32) * std
            b = jnp.zeros((out_dim,), jnp.float32)
            self.weights.append(w)
            self.biases.append(b)

        # Kernel parameters: skip-layer weights split into (h part, x_init
        # part) with 1/sqrt(2) folded in; dot operands in compute_dtype,
        # biases kept f32 so elementwise math stays f32 on every generation.
        inv_sqrt2 = 1.0 / np.sqrt(2.0)
        self._kernel_params = []
        for layer in range(self.num_layers - 1):
            w = self.weights[layer]
            b2 = self.biases[layer].reshape(-1, 1)            # (out_dim, 1) f32
            if layer in self._skip_layers:
                k = w.shape[1] - d_in
                w_h = (w[:, :k] * inv_sqrt2).astype(compute_dtype)
                w_x = (w[:, k:] * inv_sqrt2).astype(compute_dtype)
                self._kernel_params.append((w_h, w_x, b2))
            else:
                self._kernel_params.append((w.astype(compute_dtype), b2))

        # JIT the whole forward (layout plumbing + pallas_call) so the
        # cast/pad/transpose pre- and post-processing fuses and per-op
        # dispatch overhead disappears.  `tile` is a static arg.
        self._jit_forward = jax.jit(self._forward_impl, static_argnums=(1,))

    # ---- tile selection -------------------------------------------------
    def _pick_tile(self, n, tile_n):
        n_ceil = ((n + 127) // 128) * 128
        # VMEM-aware cap: a handful of live f32 activations of the widest
        # layer per step must fit comfortably (budget ~8 MiB << 64 MiB v7x).
        max_width = max(max(self.dims), 8)
        budget = 8 * 1024 * 1024
        cap = budget // (4 * max_width * 4)          # bytes / (f32 * ~4 live arrays)
        cap = max(128, (cap // 128) * 128)
        want = 4096 if tile_n is None else int(tile_n)
        tile = max(128, ((want + 127) // 128) * 128)  # lane-dense multiple of 128
        tile = min(tile, cap, n_ceil)
        return tile

    # ---- jitted forward --------------------------------------------------
    def _forward_impl(self, x, tile, *flat_params):
        orig_shape = x.shape
        x2 = x.reshape(-1, self.d_in).astype(self.compute_dtype)
        n = x2.shape[0]
        n_pad = ((n + tile - 1) // tile) * tile
        if n_pad != n:
            x2 = jnp.pad(x2, ((0, n_pad - n), (0, 0)))
        xt = x2.T                                   # (d_in, n_pad): lane-dense slab

        kernel = _make_mlp_kernel(self.num_layers, self._skip_layers)

        in_specs = [pl.BlockSpec((self.d_in, tile), lambda i: (0, i))]
        for p in flat_params:
            # Tiny, fully resident; constant index_map -> no re-DMA across steps.
            in_specs.append(pl.BlockSpec(p.shape, lambda i: (0, 0)))

        out = pl.pallas_call(
            kernel,
            out_shape=jax.ShapeDtypeStruct((self.d_out, n_pad), jnp.float32),
            grid=(n_pad // tile,),
            in_specs=in_specs,
            out_specs=pl.BlockSpec((self.d_out, tile), lambda i: (0, i)),
            compiler_params=pltpu.CompilerParams(
                dimension_semantics=("parallel",)),
        )(xt, *flat_params)

        out = out[:, :n].T                          # back to (N, d_out)
        return out.reshape(*orig_shape[:-1], self.d_out)

    def __call__(self, x, tile_n=None):
        assert x.shape[-1] == self.d_in
        n = 1
        for s in x.shape[:-1]:
            n *= int(s)
        tile = self._pick_tile(max(n, 1), tile_n)
        flat = tuple(p for lp in self._kernel_params for p in lp)
        return self._jit_forward(x, tile, *flat)

    # ---- pure-JAX reference mirroring the PyTorch forward exactly --------
    def reference(self, x):
        x = x.astype(jnp.float32)
        x_init = x
        for layer in range(self.num_layers - 1):
            if layer < self.combine_layer and layer in self.skip_in:
                x = jnp.concatenate([x, x_init], axis=-1) / np.sqrt(2)
            x = x @ self.weights[layer].T + self.biases[layer]
            if layer < self.num_layers - 2:
                x = jnp.maximum(x, 0.0)
        return x


if __name__ == "__main__":
    key = jax.random.PRNGKey(0)
    k_x, k_p = jax.random.split(key)

    d_in = 4
    # dims -> [4, 32, 32, 4]; skip at layer 1 (so lin0 outputs 32 - 4 = 28)
    net = ImplicitNetPallas(d_in=d_in, dims=[32, 32], skip_in=(1,), d_out=4, key=k_p)

    x = jax.random.normal(k_x, (2, 128, d_in), jnp.float32)   # (batch, points, d_in)
    out = net(x)
    jax.block_until_ready(out)
    ref = net.reference(x)
    assert out.shape == (2, 128, 4)
    np.testing.assert_allclose(np.asarray(out), np.asarray(ref), rtol=1e-5, atol=1e-5)

    # Row count that is NOT a multiple of the tile: exercises wrapper padding
    # and a multi-step "parallel" grid (megacore sharding on v7x).
    x_odd = jax.random.normal(jax.random.PRNGKey(3), (3, 1000, d_in), jnp.float32)
    out_odd = net(x_odd, tile_n=512)
    jax.block_until_ready(out_odd)
    ref_odd = net.reference(x_odd)
    np.testing.assert_allclose(np.asarray(out_odd), np.asarray(ref_odd),
                               rtol=1e-5, atol=1e-5)

    # bf16 dot operands (v6e/v7x input-bandwidth optimization); bias/ReLU stay
    # f32 and accumulation is f32 -> compare against the f32 reference loosely.
    net_bf16 = ImplicitNetPallas(d_in=d_in, dims=[32, 32], skip_in=(1,), d_out=4,
                                 key=k_p, compute_dtype=jnp.bfloat16)
    out_bf16 = net_bf16(x)
    jax.block_until_ready(out_bf16)
    np.testing.assert_allclose(np.asarray(out_bf16), np.asarray(ref),
                               rtol=1e-1, atol=1e-1)

    print("KERNEL_OK")
</pallas_src>

<mosaic_0001>
module attributes {stable_mosaic.version = 11 : i64} {
  func.func @kernel(%arg0: i32, %arg1: memref<4x256xf32, #tpu.memory_space<vmem>>, %arg2: memref<28x4xf32, #tpu.memory_space<vmem>>, %arg3: memref<28x1xf32, #tpu.memory_space<vmem>>, %arg4: memref<32x28xf32, #tpu.memory_space<vmem>>, %arg5: memref<32x4xf32, #tpu.memory_space<vmem>>, %arg6: memref<32x1xf32, #tpu.memory_space<vmem>>, %arg7: memref<4x32xf32, #tpu.memory_space<vmem>>, %arg8: memref<4x1xf32, #tpu.memory_space<vmem>>, %arg9: memref<4x256xf32, #tpu.memory_space<vmem>>) attributes {dimension_semantics = [#tpu.dimension_semantics<parallel>], iteration_bounds = array<i64: 1>, scalar_prefetch = 0 : i64, scratch_operands = 0 : i64, tpu.core_type = #tpu.core_type<tc>, window_params = [{transform_indices = @transform_0, window_bounds = array<i64: 4, 256>}, {pipeline_mode = #tpu.pipeline_mode<synchronous>, transform_indices = @transform_1, window_bounds = array<i64: 28, 4>}, {pipeline_mode = #tpu.pipeline_mode<synchronous>, transform_indices = @transform_2, window_bounds = array<i64: 28, 1>}, {pipeline_mode = #tpu.pipeline_mode<synchronous>, transform_indices = @transform_3, window_bounds = array<i64: 32, 28>}, {pipeline_mode = #tpu.pipeline_mode<synchronous>, transform_indices = @transform_4, window_bounds = array<i64: 32, 4>}, {pipeline_mode = #tpu.pipeline_mode<synchronous>, transform_indices = @transform_5, window_bounds = array<i64: 32, 1>}, {pipeline_mode = #tpu.pipeline_mode<synchronous>, transform_indices = @transform_6, window_bounds = array<i64: 4, 32>}, {pipeline_mode = #tpu.pipeline_mode<synchronous>, transform_indices = @transform_7, window_bounds = array<i64: 4, 1>}, {transform_indices = @transform_8, window_bounds = array<i64: 4, 256>}]} {
    %c0 = arith.constant 0 : index
    %c0_0 = arith.constant 0 : index
    %0 = vector.load %arg1[%c0, %c0_0] : memref<4x256xf32, #tpu.memory_space<vmem>>, vector<4x256xf32>
    %c0_1 = arith.constant 0 : index
    %c0_2 = arith.constant 0 : index
    %1 = vector.load %arg2[%c0_1, %c0_2] : memref<28x4xf32, #tpu.memory_space<vmem>>, vector<28x4xf32>
    %c0_3 = arith.constant 0 : index
    %c0_4 = arith.constant 0 : index
    %2 = vector.load %arg3[%c0_3, %c0_4] : memref<28x1xf32, #tpu.memory_space<vmem>>, vector<28x1xf32>
    %cst = arith.constant dense<0.000000e+00> : vector<28x256xf32>
    %3 = tpu.matmul %1, %0, %cst {dimension_numbers = #tpu.dot_dimension_numbers<[1], [0], [0], [1], [0, 0, 1, 1], [], []>} : vector<28x4xf32>, vector<4x256xf32>, vector<28x256xf32> -> vector<28x256xf32>
    %4 = vector.broadcast %2 : vector<28x1xf32> to vector<28x256xf32>
    %5 = arith.addf %3, %4 : vector<28x256xf32>
    %cst_5 = arith.constant 0.000000e+00 : f32
    %6 = vector.broadcast %cst_5 : f32 to vector<28x256xf32>
    %7 = arith.maximumf %5, %6 : vector<28x256xf32>
    %c0_6 = arith.constant 0 : index
    %c0_7 = arith.constant 0 : index
    %8 = vector.load %arg4[%c0_6, %c0_7] : memref<32x28xf32, #tpu.memory_space<vmem>>, vector<32x28xf32>
    %c0_8 = arith.constant 0 : index
    %c0_9 = arith.constant 0 : index
    %9 = vector.load %arg5[%c0_8, %c0_9] : memref<32x4xf32, #tpu.memory_space<vmem>>, vector<32x4xf32>
    %c0_10 = arith.constant 0 : index
    %c0_11 = arith.constant 0 : index
    %10 = vector.load %arg6[%c0_10, %c0_11] : memref<32x1xf32, #tpu.memory_space<vmem>>, vector<32x1xf32>
    %cst_12 = arith.constant dense<0.000000e+00> : vector<32x256xf32>
    %11 = tpu.matmul %8, %7, %cst_12 {dimension_numbers = #tpu.dot_dimension_numbers<[1], [0], [0], [1], [0, 0, 1, 1], [], []>} : vector<32x28xf32>, vector<28x256xf32>, vector<32x256xf32> -> vector<32x256xf32>
    %cst_13 = arith.constant dense<0.000000e+00> : vector<32x256xf32>
    %12 = tpu.matmul %9, %0, %cst_13 {dimension_numbers = #tpu.dot_dimension_numbers<[1], [0], [0], [1], [0, 0, 1, 1], [], []>} : vector<32x4xf32>, vector<4x256xf32>, vector<32x256xf32> -> vector<32x256xf32>
    %13 = arith.addf %11, %12 : vector<32x256xf32>
    %14 = vector.broadcast %10 : vector<32x1xf32> to vector<32x256xf32>
    %15 = arith.addf %13, %14 : vector<32x256xf32>
    %cst_14 = arith.constant 0.000000e+00 : f32
    %16 = vector.broadcast %cst_14 : f32 to vector<32x256xf32>
    %17 = arith.maximumf %15, %16 : vector<32x256xf32>
    %c0_15 = arith.constant 0 : index
    %c0_16 = arith.constant 0 : index
    %18 = vector.load %arg7[%c0_15, %c0_16] : memref<4x32xf32, #tpu.memory_space<vmem>>, vector<4x32xf32>
    %c0_17 = arith.constant 0 : index
    %c0_18 = arith.constant 0 : index
    %19 = vector.load %arg8[%c0_17, %c0_18] : memref<4x1xf32, #tpu.memory_space<vmem>>, vector<4x1xf32>
    %cst_19 = arith.constant dense<0.000000e+00> : vector<4x256xf32>
    %20 = tpu.matmul %18, %17, %cst_19 {dimension_numbers = #tpu.dot_dimension_numbers<[1], [0], [0], [1], [0, 0, 1, 1], [], []>} : vector<4x32xf32>, vector<32x256xf32>, vector<4x256xf32> -> vector<4x256xf32>
    %21 = vector.broadcast %19 : vector<4x1xf32> to vector<4x256xf32>
    %22 = arith.addf %20, %21 : vector<4x256xf32>
    %c0_20 = arith.constant 0 : index
    %c0_21 = arith.constant 0 : index
    %23 = vector.load %arg9[%c0_20, %c0_21] : memref<4x256xf32, #tpu.memory_space<vmem>>, vector<4x256xf32>
    tpu.vector_store %arg9[%c0_20, %c0_21], %22 {strides = array<i32>} : memref<4x256xf32, #tpu.memory_space<vmem>>, vector<4x256xf32>,
    return
  }
  func.func @transform_0(%arg0: i32) -> (i32, i32) {
    %c0_i32 = arith.constant 0 : i32
    %c0_i32_0 = arith.constant 0 : i32
    return %c0_i32, %arg0 : i32, i32
  }
  func.func @transform_1(%arg0: i32) -> (i32, i32) {
    %c0_i32 = arith.constant 0 : i32
    %c0_i32_0 = arith.constant 0 : i32
    %c0_i32_1 = arith.constant 0 : i32
    return %c0_i32, %c0_i32_0 : i32, i32
  }
  func.func @transform_2(%arg0: i32) -> (i32, i32) {
    %c0_i32 = arith.constant 0 : i32
    %c0_i32_0 = arith.constant 0 : i32
    %c0_i32_1 = arith.constant 0 : i32
    return %c0_i32, %c0_i32_0 : i32, i32
  }
  func.func @transform_3(%arg0: i32) -> (i32, i32) {
    %c0_i32 = arith.constant 0 : i32
    %c0_i32_0 = arith.constant 0 : i32
    %c0_i32_1 = arith.constant 0 : i32
    return %c0_i32, %c0_i32_0 : i32, i32
  }
  func.func @transform_4(%arg0: i32) -> (i32, i32) {
    %c0_i32 = arith.constant 0 : i32
    %c0_i32_0 = arith.constant 0 : i32
    %c0_i32_1 = arith.constant 0 : i32
    return %c0_i32, %c0_i32_0 : i32, i32
  }
  func.func @transform_5(%arg0: i32) -> (i32, i32) {
    %c0_i32 = arith.constant 0 : i32
    %c0_i32_0 = arith.constant 0 : i32
    %c0_i32_1 = arith.constant 0 : i32
    return %c0_i32, %c0_i32_0 : i32, i32
  }
  func.func @transform_6(%arg0: i32) -> (i32, i32) {
    %c0_i32 = arith.constant 0 : i32
    %c0_i32_0 = arith.constant 0 : i32
    %c0_i32_1 = arith.constant 0 : i32
    return %c0_i32, %c0_i32_0 : i32, i32
  }
  func.func @transform_7(%arg0: i32) -> (i32, i32) {
    %c0_i32 = arith.constant 0 : i32
    %c0_i32_0 = arith.constant 0 : i32
    %c0_i32_1 = arith.constant 0 : i32
    return %c0_i32, %c0_i32_0 : i32, i32
  }
  func.func @transform_8(%arg0: i32) -> (i32, i32) {
    %c0_i32 = arith.constant 0 : i32
    %c0_i32_0 = arith.constant 0 : i32
    return %c0_i32, %arg0 : i32, i32
  }
}

</mosaic_0001>

<bundles_post_ra>
// kernel: _forward_impl.1
= control target key start
LH: loop header
LB: loop body
LE: loop exit
PB: predicated region body
PF: predicated region fallthrough
CT: control target
= control target key end

     0   :  { %vm74_vm0 = vcmask 1043456   ;;  %v612_v2 = vmov 0.0   ;;  %vm61_vm1 = vcmask 31744   ;;  %v613_v5 = vmov 0   ;;  %s770_s0 = inlined_call_operand.vmem [shape: f32[4,256], index: 0, kind: input, shape index: {}]   ;;  %s771_s1 = inlined_call_operand.vmem [shape: f32[28,4], index: 1, kind: input, shape index: {}]   ;;  %s772_s2 = inlined_call_operand.vmem [shape: f32[28,1], index: 2, kind: input, shape index: {}]   ;;  %s773_s3 = inlined_call_operand.vmem [shape: f32[32,28], index: 3, kind: input, shape index: {}]   ;;  %s774_s4 = inlined_call_operand.vmem [shape: f32[32,4], index: 4, kind: input, shape index: {}]   ;;  %s775_s5 = inlined_call_operand.vmem [shape: f32[32,1], index: 5, kind: input, shape index: {}]   ;;  %s776_s6 = inlined_call_operand.vmem [shape: f32[4,32], index: 6, kind: input, shape index: {}]   ;;  %s777_s7 = inlined_call_operand.vmem [shape: f32[4,1], index: 7, kind: input, shape index: {}]   ;;  %s778_s8 = inlined_call_operand.hbm [shape: f32[4,256], index: 8, kind: output, shape index: {}]  }
   0x1   :  { %v30_v0 = vld [vmem:[%s770_s0] sm:$0xff]  ;;  %143 = vmatprep.mubr.f32.mxu0 %v612_v2  ;;  %276 = vmatprep.mubr.f32.mxu1 %v612_v2  ;;  %v37_v6 = vld [vmem:[%s772_s2 + $0x10] sm:$0xff]  ;;  %v36_v7 = vld [vmem:[%s772_s2 + $0x8] sm:$0xff] }
   0x2   :  { %v60_v1 = vcombine.high %v30_v0, %v30_v0  ;;  %v35_v3 = vld [vmem:[%s772_s2] sm:$0xff]  ;;  %585 = vset.pattern.permute.xlu0 %v613_v5  ;;  %586 = vset.pattern.permute.xlu1 %v613_v5 }
   0x3   :  { %v31_v4 = vld [vmem:[%s771_s1] sm:$0xff]  ;;  %41 = vperm.xlu0 %585, %v35_v3   ;;  %51 = vperm.xlu1 %586, %v37_v6  }
   0x4   :  { %534 = vmatprep.subr.msk.mxu0 %vm74_vm0, %v60_v1 }
   0x5   :  { %535 = vmatpush1.msk.msra.mxu0 %vm74_vm0, %v30_v0 }
   0x6   :  { %13 = vsyncpa [#allocation3], 0  ;;  %536 = vmatmul.mubr.msk.f32.vlgmr.msra.gmra.mrb[0].mxu0 %vm61_vm1, %v31_v4  ;;  %v38_v8 = vld [vmem:[%s772_s2 + $0x18] sm:$0xf]  ;;  %540 = vmatprep.subr.msk.mxu0 %vm74_vm0, %v60_v1  ;;  %v32_v9 = vld [vmem:[%s771_s1 + $0x8] sm:$0xff]  ;;  %vm614_vm2 = vmmov 1  }
   0x7   :  { %149 = vmatprep.mubr.f32.mxu0 %v612_v2  ;;  %571 = vmatprep.subr.msk.mxu1 %vm74_vm0, %v60_v1  ;;  %v184_v10 = vld [vmem:[%s775_s5] sm:$0xff]  ;;  %v185_v11 = vld [vmem:[%s775_s5 + $0x8] sm:$0xff]  ;;  %v33_v12 = vld [vmem:[%s771_s1 + $0x10] sm:$0xff]  ;;  %vm289_vm4 = vcmask 228352   ;;  %vm440_vm5 = vcmask 261120   ;;  %s615_s20 = smov [#allocation2]  }
   0x8   :  { %46 = vperm.xlu0 %585, %v36_v7   ;;  %541 = vmatpush1.msk.msra.mxu0 %vm74_vm0, %v30_v0  ;;  %v186_v13 = vld [vmem:[%s775_s5 + $0x10] sm:$0xff]  ;;  %v187_v14 = vld [vmem:[%s775_s5 + $0x18] sm:$0xff]  ;;  %v434_v16 = vld [vmem:[%s777_s7] sm:$0xf]  ;;  %s526_s21 = sshll.u32 %s615_s20, 4  ;;  %s527_s21 = int_to_ptr.vmem [resolvable:$true] %s526_s21 }
   0x9   :  { %56 = vperm.xlu1 %586, %v38_v8   ;;  %572 = vmatpush1.msk.msra.mxu1 %vm74_vm0, %v30_v0  ;;  %v34_v15 = vld [vmem:[%s771_s1 + $0x18] sm:$0xf]  ;;  %v182_v17 = vld [vmem:[%s774_s4 + $0x10] sm:$0xff]  ;;  %v180_v19 = vld [vmem:[%s774_s4] sm:$0xff]  ;;  %s588_s22 = scalar_lea.vmem %s527_s21, 128  ;;  %p593_p1 = scmp.lt.s32.totalorder %s527_s21, %s527_s21 }
   0xa   :  { %537 = vmatmul.mubr.msk.f32.gmra.mrb[2].mxu0 %vm61_vm1, %v32_v9  ;;  %544 = vmatmul.mubr.msk.f32.vlgmr.msra.gmra.mrb[0].mxu1 %vm61_vm1, %v182_v17  ;;  %v183_v18 = vld [vmem:[%s774_s4 + $0x18] sm:$0xff]  ;;  %v181_v20 = vld [vmem:[%s774_s4 + $0x8] sm:$0xff]  ;;  %vm558_vm3 = vmpackc.low %vm74_vm0, %vm614_vm2  ;;  %p589_p0 = scmp.ne.s32.totalorder %s527_s21, %s588_s22  ;;  %p594_p2 = scmp.lt.s32.totalorder %s588_s22, %s588_s22 }
   0xb   :  { %155 = vmatprep.mubr.f32.mxu0 %v612_v2  ;;  %282 = vmatprep.mubr.f32.mxu1 %v612_v2  ;;  %v176_v53 = vld [vmem:[%s773_s3] sm:$0xff]  ;;  %v177_v54 = vld [vmem:[%s773_s3 + $0x8] sm:$0xff]  ;;  %v178_v55 = vld [vmem:[%s773_s3 + $0x10] sm:$0xff] }
   0xc   :  { %399 = vperm.xlu0 %585, %v184_v10   ;;  %v179_v56 = vld [vmem:[%s773_s3 + $0x18] sm:$0xff]  ;;  %p595_p3 = por %p594_p2, %p593_p1 }
   0xd   :  { %404 = vperm.xlu1 %586, %v185_v11  }
   0xe   :  { %538 = vmatmul.mubr.msk.f32.gmra.mrb[4].mxu0 %vm61_vm1, %v33_v12  ;;  %545 = vmatmul.mubr.msk.f32.gmra.mrb[2].mxu1 %vm61_vm1, %v183_v18  ;;  %p596_p4 = pnand %p595_p3, %p589_p0 }
   0xf   :  { %161 = vmatprep.mubr.f32.mxu0 %v612_v2  ;;  %372 = vmatprep.mubr.f32.mxu1 %v612_v2 }
  0x10   :  { %409 = vperm.xlu0 %585, %v186_v13  }
  0x11   :  { %414 = vperm.xlu1 %586, %v187_v14  }
  0x12   :  { %539 = vmatmul.mubr.msk.f32.gmra.mrb[6].mxu0 %vm61_vm1, %v34_v15 }
  0x13   :  { %264 = vmatprep.mubr.f32.mxu0 %v612_v2 }
  0x14   :  { %437 = vperm.xlu0 %585, %v434_v16  }
  0x16   :  { %542 = vmatmul.mubr.msk.f32.vlgmr.msra.gmra.mrb[8].mxu0 %vm61_vm1, %v180_v19 }
  0x17   :  { %270 = vmatprep.mubr.f32.mxu0 %v612_v2 }
  0x1a   :  { %543 = vmatmul.mubr.msk.f32.gmra.mrb[10].mxu0 %vm61_vm1, %v181_v20 }
  0x1b   :  { %508 = vmatprep.mubr.f32.mxu0 %v612_v2 }
  0x82   :  { %v42_v21 = vpop.permute.xlu0 %41  ;;  %v52_v30 = vpop.permute.xlu1 %51 }
  0x87   :  { %v47_v25 = vpop.permute.xlu0 %46 }
  0x88   :  { %v57_v41 = vpop.permute.xlu1 %56 }
  0x8b   :  { %v400_v1 = vpop.permute.xlu0 %399 }
  0x8c   :  { %v405_v7 = vpop.permute.xlu1 %404 }
  0x8f   :  { %v410_v15 = vpop.permute.xlu0 %409 }
  0x90   :  { %v415_v20 = vpop.permute.xlu1 %414 }
  0xd9   :  { %v145_v22 = vpop.f32.mrb[0].mxu0 }
  0xda   :  { %v147_v23 = vpop.f32.mrb[1].mxu0  ;;  %v146_v24 = vadd.f32 %v145_v22, %v42_v21 }
  0xdb   :  { %v148_v26 = vadd.f32 %v147_v23, %v42_v21 }
  0xdc   :  { %v168_v32 = vmax.f32 %v146_v24, 0.0 }
  0xdd   :  { %v151_v27 = vpop.f32.mrb[2].mxu0  ;;  %v169_v34 = vmax.f32 %v148_v26, 0.0 }
  0xde   :  { %v152_v28 = vadd.f32 %v151_v27, %v47_v25  ;;  %v153_v29 = vpop.f32.mrb[3].mxu0 }
  0xdf   :  { %v154_v31 = vadd.f32 %v153_v29, %v47_v25 }
  0xe0   :  { %v170_v33 = vmax.f32 %v152_v28, 0.0 }
  0xe1   :  { %v171_v35 = vmax.f32 %v154_v31, 0.0  ;;  %v157_v36 = vpop.f32.mrb[4].mxu0 }
  0xe2   :  { %v555_v37 = vpack.c.bf16 %v170_v33, %v168_v32  ;;  %v159_v38 = vpop.f32.mrb[5].mxu0  ;;  %v158_v40 = vadd.f32 %v157_v36, %v52_v30  ;;  %v433_v33 = vld [vmem:[%s776_s6] sm:$0xf] }
  0xe3   :  { %v553_v39 = vpack.c.bf16 %v171_v35, %v169_v34  ;;  %v160_v42 = vadd.f32 %v159_v38, %v52_v30  ;;  %v438_v34 = vpop.permute.xlu0 %437 }
  0xe4   :  { %v172_v47 = vmax.f32 %v158_v40, 0.0 }
  0xe5   :  { %v163_v43 = vpop.f32.mrb[6].mxu0  ;;  %554 = vmatprep.subr.bf16.mxu1 %v553_v39  ;;  %v173_v49 = vmax.f32 %v160_v42, 0.0 }
  0xe6   :  { %v164_v44 = vadd.f32 %v163_v43, %v57_v41  ;;  %v165_v45 = vpop.f32.mrb[7].mxu0  ;;  %556 = vmatpush1.bf16.msra.mxu1 %v555_v37 }
  0xe7   :  { %v166_v46 = vadd.f32 %v165_v45, %v57_v41 }
  0xe8   :  { %v174_v48 = vmax.f32 %v164_v44, 0.0 }
  0xe9   :  { %v175_v50 = vmax.f32 %v166_v46, 0.0  ;;  %v266_v57 = vpop.f32.mrb[8].mxu0 }
  0xea   :  { %v560_v51 = vpack.c.bf16 %v174_v48, %v172_v47  ;;  %v268_v58 = vpop.f32.mrb[9].mxu0 }
  0xeb   :  { %v557_v52 = vpack.c.bf16 %v175_v50, %v173_v49 }
  0xed   :  { %559 = vmatprep.subr.msk.bf16.mxu1 %vm558_vm3, %v557_v52  ;;  %v272_v59 = vpop.f32.mrb[10].mxu0 }
  0xee   :  { %562 = vmatpush1.bf16.msk.msra.mxu1 %vm558_vm3, %v560_v51  ;;  %v274_v60 = vpop.f32.mrb[11].mxu0 }
  0xf1   :  { %548 = vmatmul.mubr.msk.f32.vlgmr.msra.gmra.mrb[4].mxu1 %vm289_vm4, %v176_v53 }
  0xf2   :  { %378 = vmatprep.mubr.f32.mxu1 %v612_v2 }
  0xf5   :  { %549 = vmatmul.mubr.msk.f32.gmra.mrb[6].mxu1 %vm289_vm4, %v177_v54 }
  0xf6   :  { %384 = vmatprep.mubr.f32.mxu1 %v612_v2 }
  0xf9   :  { %550 = vmatmul.mubr.msk.f32.gmra.mrb[0].mxu1 %vm289_vm4, %v178_v55 }
  0xfa   :  { %390 = vmatprep.mubr.f32.mxu1 %v612_v2 }
  0xfd   :  { %551 = vmatmul.mubr.msk.f32.gmra.mrb[2].mxu1 %vm289_vm4, %v179_v56 }
 0x1c4   :  { %v374_v61 = vpop.f32.mrb[4].mxu1 }
 0x1c5   :  { %v375_v62 = vadd.f32 %v374_v61, %v266_v57  ;;  %v376_v63 = vpop.f32.mrb[5].mxu1 }
 0x1c6   :  { %v377_v0 = vadd.f32 %v376_v63, %v268_v58 }
 0x1c7   :  { %v417_v4 = vadd.f32 %v400_v1, %v375_v62 }
 0x1c8   :  { %v380_v3 = vpop.f32.mrb[6].mxu1  ;;  %v418_v2 = vadd.f32 %v400_v1, %v377_v0 }
 0x1c9   :  { %v381_v5 = vadd.f32 %v380_v3, %v272_v59  ;;  %v382_v6 = vpop.f32.mrb[7].mxu1  ;;  %v425_v12 = vmax.f32 %v417_v4, 0.0 }
 0x1ca   :  { %v383_v8 = vadd.f32 %v382_v6, %v274_v60  ;;  %v426_v16 = vmax.f32 %v418_v2, 0.0 }
 0x1cb   :  { %v419_v9 = vadd.f32 %v405_v7, %v381_v5 }
 0x1cc   :  { %v420_v10 = vadd.f32 %v405_v7, %v383_v8  ;;  %v386_v11 = vpop.f32.mrb[0].mxu1 }
 0x1cd   :  { %v427_v13 = vmax.f32 %v419_v9, 0.0  ;;  %v388_v14 = vpop.f32.mrb[1].mxu1  ;;  %v421_v19 = vadd.f32 %v410_v15, %v386_v11 }
 0x1ce   :  { %v428_v17 = vmax.f32 %v420_v10, 0.0  ;;  %v422_v21 = vadd.f32 %v410_v15, %v388_v14 }
 0x1cf   :  { %v565_v18 = vpack.c.bf16 %v427_v13, %v425_v12  ;;  %v429_v27 = vmax.f32 %v421_v19, 0.0 }
 0x1d0   :  { %v392_v22 = vpop.f32.mrb[2].mxu1  ;;  %v563_v23 = vpack.c.bf16 %v428_v17, %v426_v16  ;;  %v430_v29 = vmax.f32 %v422_v21, 0.0 }
 0x1d1   :  { %v423_v24 = vadd.f32 %v415_v20, %v392_v22  ;;  %v394_v25 = vpop.f32.mrb[3].mxu1 }
 0x1d2   :  { %v424_v26 = vadd.f32 %v415_v20, %v394_v25  ;;  %564 = vmatprep.subr.bf16.mxu0 %v563_v23 }
 0x1d3   :  { %v431_v28 = vmax.f32 %v423_v24, 0.0  ;;  %566 = vmatpush1.bf16.msra.mxu0 %v565_v18 }
 0x1d4   :  { %v432_v30 = vmax.f32 %v424_v26, 0.0 }
 0x1d5   :  { %v569_v31 = vpack.c.bf16 %v431_v28, %v429_v27 }
 0x1d6   :  { %v567_v32 = vpack.c.bf16 %v432_v30, %v430_v29 }
 0x1d8   :  { %568 = vmatprep.subr.bf16.mxu0 %v567_v32 }
 0x1d9   :  { %570 = vmatpush1.bf16.msra.mxu0 %v569_v31 }
 0x1dc   :  { %552 = vmatmul.mubr.msk.f32.vlgmr.msra.gmra.mrb[12].mxu0 %vm440_vm5, %v433_v33 }
 0x2af   :  { %v510_v35 = vpop.f32.mrb[12].mxu0 }
 0x2b0   :  { %v511_v36 = vadd.f32 %v510_v35, %v438_v34  ;;  %v512_v37 = vpop.f32.mrb[13].mxu0 }
 0x2b1   :  { %v513_v38 = vadd.f32 %v512_v37, %v438_v34 }
 0x2b3   :  { %v517_v39 = vcombine.low %v511_v36, %v513_v38 }
 0x2b5   :  { %519 = vst [vmem:[#allocation2] sm:$0xff] %v517_v39 }
 0x2b6   :  { %599 = shalt.err (!%p596_p4)
}
 0x2b7   :  { %s600_s24 = scalar_lea.hbm %s778_s8, 128 }
 0x2b8   :  { %p601_p5 = scmp.ne.s32.totalorder %s778_s8, %s600_s24  ;;  %p604_p6 = scmp.lt.u32.totalorder %s600_s24, %s778_s8 }
 0x2ba   :  { %p606_p7 = pnand %p604_p6, %p601_p5 }
 0x2bc   :  { %609 = shalt.err (!%p606_p7)
}
 0x2bd   :  { %529 = dma.vmem_to_hbm [thread:$0]  %s527_s21, 128, %s778_s8, [#allocation3]  }
 0x2be   :  { %610 = dma.done.wait [#allocation3], 128  }
 0x2bf   :  { %611 = vsyncadd [#allocation3], 4294967168 }
 0x2c0   :  { %533 = vsyncpa [#allocation3], 1 }

</bundles_post_ra>
